<compile_context>
chip_gen: v7x
topology: tpu7x:2x2x1
jax: 0.10.0
libtpu: 0.0.40
codegen_flags: <defaults>
</compile_context>

<pallas_src>
import functools
import math

import jax
import jax.numpy as jnp
from jax.experimental import pallas as pl
from jax.experimental.pallas import tpu as pltpu

_GELU_C = math.sqrt(2.0 / math.pi)
_MIB = 1024 * 1024


def _ffn_kernel(x_ref, w1_ref, b1_ref, w2_ref, b2_ref, o_ref, acc_ref):
    # x_ref:  (tm, d_model)
    # w1_ref: (d_model, tf)   b1_ref: (1, tf)
    # w2_ref: (tf, d_model)   b2_ref: (1, d_model)
    # acc_ref: (tm, d_model) f32 scratch accumulator (resident across j)
    j = pl.program_id(1)

    @pl.when(j == 0)
    def _init():
        # Fold the second-layer bias into the accumulator init: removes one
        # full (tm, d_model) VPU add per row tile.
        acc_ref[...] = jnp.broadcast_to(
            b2_ref[...].astype(jnp.float32), acc_ref.shape)

    # First linear on this d_ff slab. Operands go to the MXU in their native
    # dtype (bf16 inputs/weights stay bf16); accumulation is f32.
    h = jnp.dot(x_ref[...], w1_ref[...], preferred_element_type=jnp.float32)
    h = h + b1_ref[...].astype(jnp.float32)

    # GaussianRectifier (tanh-approx GELU), f32 math (tanh lands on the EUP slot).
    g = 0.5 * h * (1.0 + jnp.tanh(_GELU_C * (h + 0.044715 * (h * h * h))))

    # Dropout: identity (eval mode).
    # TODO(synk): training-mode dropout would use pltpu.prng_seed/prng_random_bits.

    # Second linear: accumulate this slab's contribution into the f32 accumulator.
    acc_ref[...] += jnp.dot(g.astype(w2_ref.dtype), w2_ref[...],
                            preferred_element_type=jnp.float32)

    @pl.when(j == pl.num_programs(1) - 1)
    def _finalize():
        o_ref[...] = acc_ref[...].astype(o_ref.dtype)


def _round_up(x, m):
    return ((x + m - 1) // m) * m


def _tpu_params():
    """Return (vmem_capacity_bytes, dual_tensorcore) with a safe fallback."""
    vmem_cap = None
    try:
        info = pltpu.get_tpu_info()
        vmem_cap = int(getattr(info, "vmem_capacity_bytes", 0)) or None
    except Exception:
        vmem_cap = None
    if not vmem_cap:
        vmem_cap = 64 * _MIB          # conservative: legal on every generation
    # v7x exposes 64 MiB VMEM per TensorCore and has 2 TCs per chip.
    dual_core = vmem_cap <= 96 * _MIB
    return vmem_cap, dual_core


def _vmem_estimate(tm, tf, d_model, d_ff, in_bytes, w_bytes, out_bytes,
                   single_buffer):
    resident = single_buffer and (tf == d_ff)
    wmult = 1 if resident else 2                       # pipeline buffer count
    x_bufs = 2 * tm * d_model * in_bytes               # double-buffered x tile
    o_bufs = 2 * tm * d_model * out_bytes              # double-buffered out tile
    w_bufs = wmult * 2 * d_model * tf * w_bytes        # W1 + W2 slabs
    b_bufs = (wmult * tf * w_bytes
              + (1 if single_buffer else 2) * d_model * w_bytes)
    acc = tm * d_model * 4                             # f32 accumulator scratch
    # GELU chain keeps ~3 live (tm, tf) f32 temporaries plus the cast operand
    # feeding the second matmul.
    inter = tm * tf * (3 * 4 + w_bytes)
    return x_bufs + o_bufs + w_bufs + b_bufs + acc + inter


def _pick_tiles(n, d_model, d_ff, in_bytes, w_bytes, out_bytes,
                vmem_cap, dual_core, single_buffer):
    # Generation-aware budget: ~100 MiB on 128 MiB chips (v5e/v6e), ~40 MiB on
    # v7x (64 MiB per TensorCore).
    budget = max(min(vmem_cap - 24 * _MIB, 100 * _MIB), 24 * _MIB)
    est = functools.partial(
        _vmem_estimate, d_model=d_model, d_ff=d_ff, in_bytes=in_bytes,
        w_bytes=w_bytes, out_bytes=out_bytes, single_buffer=single_buffer)

    # Row tile: MXU-aligned (multiple of 128; 256/512 preferred).
    if n < 128:
        tm = _round_up(n, 8)          # tiny problem; padding to 128 is pointless
    else:
        tm = min(512, _round_up(n, 128))
        # Keep >= 2 row-grid steps only on dual-TensorCore chips (v7x megacore);
        # on v5e/v6e halving tm only lowers arithmetic intensity.
        if dual_core and tm > 256 and _round_up(n, tm) // tm < 2:
            tm = 256

    # d_ff slab: full weight residency whenever it fits the budget.
    if d_ff <= 128 or d_ff % 128 != 0 or est(tm=tm, tf=d_ff) <= budget:
        tf = d_ff
    else:
        # Largest divisor of d_ff that is a multiple of 128 and fits the budget.
        tf = 128
        for cand in range(256, d_ff, 128):
            if d_ff % cand == 0 and est(tm=tm, tf=cand) <= budget:
                tf = cand
        # Streamed-weight path: per-slab DMA bytes are fixed while MXU FLOPs
        # scale with tm, so raise the row tile if rows and VMEM allow it.
        for cand_tm in (1024, 768):
            enough_rows = n >= (2 * cand_tm if dual_core else cand_tm)
            if enough_rows and est(tm=cand_tm, tf=tf) <= budget:
                tm = cand_tm
                break

    # Last resort: shrink the row tile (staying 128-aligned) if still over budget.
    while est(tm=tm, tf=tf) > budget and tm > 128:
        tm = max(128, _round_up(tm // 2, 128))
    return tm, tf


@functools.partial(jax.jit,
                   static_argnames=("tm", "tf", "single_buffer", "vmem_limit"))
def _feed_forward_impl(x, w1, b1, w2, b2, *, tm, tf, single_buffer, vmem_limit):
    n, d_model = x.shape
    d_ff = w1.shape[1]

    n_pad = _round_up(n, tm)
    if n_pad != n:
        x = jnp.pad(x, ((0, n_pad - n), (0, 0)))

    b1_2d = b1.reshape(1, d_ff)
    b2_2d = b2.reshape(1, d_model)

    weights_resident = (tf == d_ff)

    def spec(shape, index_map, grid_invariant):
        # Grid-invariant operands never change block index; a single VMEM buffer
        # suffices (saves a full extra copy of W1/W2 -- important on v7x's 64 MiB).
        if single_buffer and grid_invariant:
            return pl.BlockSpec(shape, index_map, pipeline_mode=pl.Buffered(1))
        return pl.BlockSpec(shape, index_map)

    grid = (n_pad // tm, d_ff // tf)
    out = pl.pallas_call(
        _ffn_kernel,
        out_shape=jax.ShapeDtypeStruct((n_pad, d_model), x.dtype),
        grid_spec=pltpu.PrefetchScalarGridSpec(
            num_scalar_prefetch=0,
            grid=grid,
            in_specs=[
                pl.BlockSpec((tm, d_model), lambda i, j: (i, 0)),            # x rows
                spec((d_model, tf), lambda i, j: (0, j), weights_resident),  # W1
                spec((1, tf), lambda i, j: (0, j), weights_resident),        # b1
                spec((tf, d_model), lambda i, j: (j, 0), weights_resident),  # W2
                spec((1, d_model), lambda i, j: (0, 0), True),               # b2
            ],
            out_specs=pl.BlockSpec((tm, d_model), lambda i, j: (i, 0)),
            scratch_shapes=[pltpu.VMEM((tm, d_model), jnp.float32)],
        ),
        compiler_params=pltpu.CompilerParams(
            dimension_semantics=("parallel", "arbitrary"),
            vmem_limit_bytes=vmem_limit,
        ),
    )(x, w1, b1_2d, w2, b2_2d)

    if n_pad != n:
        out = out[:n]
    return out


def feed_forward(x, w1, b1, w2, b2, *, tm=None, tf=None, use_bf16_matmul=False):
    """FeedForward forward pass (matches the PyTorch module, eval-mode dropout).

    x: (..., d_model); w1: (d_model, d_ff); b1: (d_ff,);
    w2: (d_ff, d_model); b2: (d_model,).
    Weights are stored pre-transposed so the kernel computes x @ W,
    equivalent to PyTorch's x @ weight.T.
    """
    *lead, d_model = x.shape
    d_ff = w1.shape[1]
    n = math.prod(lead) if lead else 1
    orig_dtype = x.dtype
    x2d = x.reshape(n, d_model)

    # Optional (numerics-visible) bf16 MXU path for f32 models; accumulation and
    # GELU stay in f32 inside the kernel.  Off by default.
    if use_bf16_matmul and x.dtype == jnp.float32:
        x2d = x2d.astype(jnp.bfloat16)
        w1 = w1.astype(jnp.bfloat16)
        w2 = w2.astype(jnp.bfloat16)

    in_bytes = x2d.dtype.itemsize
    w_bytes = w1.dtype.itemsize
    out_bytes = in_bytes

    vmem_cap, dual_core = _tpu_params()

    last_err = None
    # Prefer single-buffered grid-invariant weights; fall back to the default
    # double-buffered pipeline if this JAX build rejects pl.Buffered(1).
    for single_buffer in (True, False):
        auto_tm, auto_tf = _pick_tiles(n, d_model, d_ff, in_bytes, w_bytes,
                                       out_bytes, vmem_cap, dual_core,
                                       single_buffer)
        tm_use = auto_tm if tm is None else tm
        tf_use = auto_tf if tf is None else tf
        est = _vmem_estimate(tm_use, tf_use, d_model, d_ff, in_bytes, w_bytes,
                             out_bytes, single_buffer)
        vmem_limit = int(min(max(est + 16 * _MIB, 32 * _MIB),
                             vmem_cap - 16 * _MIB))
        try:
            out2d = _feed_forward_impl(x2d, w1, b1, w2, b2, tm=tm_use,
                                       tf=tf_use, single_buffer=single_buffer,
                                       vmem_limit=vmem_limit)
            return out2d.reshape(*lead, d_model).astype(orig_dtype)
        except Exception as e:  # retry once with plain double-buffered specs
            last_err = e
    raise last_err


def _reference(x, w1, b1, w2, b2):
    h = x @ w1 + b1
    g = 0.5 * h * (1.0 + jnp.tanh(_GELU_C * (h + 0.044715 * h ** 3)))
    return g @ w2 + b2


if __name__ == "__main__":
    # Small shapes consistent with the module: batch=2, seq=8, d_model=32, d_ff=64
    batch, seq, d_model, d_ff = 2, 8, 32, 64
    key = jax.random.PRNGKey(0)
    kx, kw1, kb1, kw2, kb2 = jax.random.split(key, 5)

    x = jax.random.normal(kx, (batch, seq, d_model), dtype=jnp.float32)

    # Deterministic param init (nn.Linear-like bounds; weights pre-transposed).
    bound1 = 1.0 / math.sqrt(d_model)
    bound2 = 1.0 / math.sqrt(d_ff)
    w1 = jax.random.uniform(kw1, (d_model, d_ff), jnp.float32, -bound1, bound1)
    b1 = jax.random.uniform(kb1, (d_ff,), jnp.float32, -bound1, bound1)
    w2 = jax.random.uniform(kw2, (d_ff, d_model), jnp.float32, -bound2, bound2)
    b2 = jax.random.uniform(kb2, (d_model,), jnp.float32, -bound2, bound2)

    out = feed_forward(x, w1, b1, w2, b2)
    jax.block_until_ready(out)

    ref = _reference(x.reshape(batch * seq, d_model), w1, b1, w2, b2)
    ref = ref.reshape(batch, seq, d_model)
    assert jnp.allclose(out, ref, atol=1e-5, rtol=1e-5), "mismatch vs reference"

    print("KERNEL_OK")
</pallas_src>

<mosaic_0001>
module attributes {stable_mosaic.version = 11 : i64} {
  func.func @_ffn_kernel(%arg0: i32, %arg1: i32, %arg2: memref<16x32xf32, #tpu.memory_space<vmem>>, %arg3: memref<32x64xf32, #tpu.memory_space<vmem>>, %arg4: memref<1x64xf32, #tpu.memory_space<vmem>>, %arg5: memref<64x32xf32, #tpu.memory_space<vmem>>, %arg6: memref<1x32xf32, #tpu.memory_space<vmem>>, %arg7: memref<16x32xf32, #tpu.memory_space<vmem>>, %arg8: memref<16x32xf32, #tpu.memory_space<vmem>>) attributes {dimension_semantics = [#tpu.dimension_semantics<parallel>, #tpu.dimension_semantics<arbitrary>], iteration_bounds = array<i64: 1, 1>, scalar_prefetch = 0 : i64, scratch_operands = 1 : i64, tpu.core_type = #tpu.core_type<tc>, window_params = [{transform_indices = @transform_0, window_bounds = array<i64: 16, 32>}, {pipeline_mode = #tpu.pipeline_mode<synchronous>, transform_indices = @transform_1, window_bounds = array<i64: 32, 64>}, {pipeline_mode = #tpu.pipeline_mode<synchronous>, transform_indices = @transform_2, window_bounds = array<i64: 1, 64>}, {pipeline_mode = #tpu.pipeline_mode<synchronous>, transform_indices = @transform_3, window_bounds = array<i64: 64, 32>}, {pipeline_mode = #tpu.pipeline_mode<synchronous>, transform_indices = @transform_4, window_bounds = array<i64: 1, 32>}, {transform_indices = @transform_5, window_bounds = array<i64: 16, 32>}]} {
    %c0_i32 = arith.constant 0 : i32
    %0 = arith.cmpi eq, %arg1, %c0_i32 : i32
    %1 = arith.extui %0 : i1 to i32
    %c0_i32_0 = arith.constant 0 : i32
    %2 = arith.cmpi ne, %1, %c0_i32_0 : i32
    scf.if %2 {
      %c0_19 = arith.constant 0 : index
      %c0_20 = arith.constant 0 : index
      %30 = vector.load %arg6[%c0_19, %c0_20] : memref<1x32xf32, #tpu.memory_space<vmem>>, vector<1x32xf32>
      %31 = vector.shape_cast %30 : vector<1x32xf32> to vector<1x32xf32>
      %32 = vector.broadcast %31 : vector<1x32xf32> to vector<16x32xf32>
      %c0_21 = arith.constant 0 : index
      %c0_22 = arith.constant 0 : index
      %33 = vector.load %arg8[%c0_21, %c0_22] : memref<16x32xf32, #tpu.memory_space<vmem>>, vector<16x32xf32>
      tpu.vector_store %arg8[%c0_21, %c0_22], %32 {strides = array<i32>} : memref<16x32xf32, #tpu.memory_space<vmem>>, vector<16x32xf32>,
    } else {
    }
    %c0 = arith.constant 0 : index
    %c0_1 = arith.constant 0 : index
    %3 = vector.load %arg2[%c0, %c0_1] : memref<16x32xf32, #tpu.memory_space<vmem>>, vector<16x32xf32>
    %c0_2 = arith.constant 0 : index
    %c0_3 = arith.constant 0 : index
    %4 = vector.load %arg3[%c0_2, %c0_3] : memref<32x64xf32, #tpu.memory_space<vmem>>, vector<32x64xf32>
    %cst = arith.constant dense<0.000000e+00> : vector<16x64xf32>
    %5 = tpu.matmul %3, %4, %cst {dimension_numbers = #tpu.dot_dimension_numbers<[1], [0], [0], [1], [0, 0, 1, 1], [], []>} : vector<16x32xf32>, vector<32x64xf32>, vector<16x64xf32> -> vector<16x64xf32>
    %c0_4 = arith.constant 0 : index
    %c0_5 = arith.constant 0 : index
    %6 = vector.load %arg4[%c0_4, %c0_5] : memref<1x64xf32, #tpu.memory_space<vmem>>, vector<1x64xf32>
    %7 = vector.broadcast %6 : vector<1x64xf32> to vector<16x64xf32>
    %8 = arith.addf %5, %7 : vector<16x64xf32>
    %cst_6 = arith.constant 5.000000e-01 : f32
    %9 = vector.broadcast %cst_6 : f32 to vector<16x64xf32>
    %10 = arith.mulf %9, %8 : vector<16x64xf32>
    %11 = arith.mulf %8, %8 : vector<16x64xf32>
    %12 = arith.mulf %11, %8 : vector<16x64xf32>
    %cst_7 = arith.constant 4.471500e-02 : f32
    %13 = vector.broadcast %cst_7 : f32 to vector<16x64xf32>
    %14 = arith.mulf %13, %12 : vector<16x64xf32>
    %15 = arith.addf %8, %14 : vector<16x64xf32>
    %cst_8 = arith.constant 0.797884583 : f32
    %16 = vector.broadcast %cst_8 : f32 to vector<16x64xf32>
    %17 = arith.mulf %16, %15 : vector<16x64xf32>
    %18 = math.tanh %17 : vector<16x64xf32>
    %cst_9 = arith.constant 1.000000e+00 : f32
    %19 = vector.broadcast %cst_9 : f32 to vector<16x64xf32>
    %20 = arith.addf %19, %18 : vector<16x64xf32>
    %21 = arith.mulf %10, %20 : vector<16x64xf32>
    %c0_10 = arith.constant 0 : index
    %c0_11 = arith.constant 0 : index
    %22 = vector.load %arg8[%c0_10, %c0_11] : memref<16x32xf32, #tpu.memory_space<vmem>>, vector<16x32xf32>
    %c0_12 = arith.constant 0 : index
    %c0_13 = arith.constant 0 : index
    %23 = vector.load %arg5[%c0_12, %c0_13] : memref<64x32xf32, #tpu.memory_space<vmem>>, vector<64x32xf32>
    %cst_14 = arith.constant dense<0.000000e+00> : vector<16x32xf32>
    %24 = tpu.matmul %21, %23, %cst_14 {dimension_numbers = #tpu.dot_dimension_numbers<[1], [0], [0], [1], [0, 0, 1, 1], [], []>} : vector<16x64xf32>, vector<64x32xf32>, vector<16x32xf32> -> vector<16x32xf32>
    %25 = arith.addf %22, %24 : vector<16x32xf32>
    %c0_15 = arith.constant 0 : index
    %c0_16 = arith.constant 0 : index
    %26 = vector.load %arg8[%c0_15, %c0_16] : memref<16x32xf32, #tpu.memory_space<vmem>>, vector<16x32xf32>
    tpu.vector_store %arg8[%c0_15, %c0_16], %25 {strides = array<i32>} : memref<16x32xf32, #tpu.memory_space<vmem>>, vector<16x32xf32>,
    %c0_i32_17 = arith.constant 0 : i32
    %27 = arith.cmpi eq, %arg1, %c0_i32_17 : i32
    %28 = arith.extui %27 : i1 to i32
    %c0_i32_18 = arith.constant 0 : i32
    %29 = arith.cmpi ne, %28, %c0_i32_18 : i32
    scf.if %29 {
      %c0_19 = arith.constant 0 : index
      %c0_20 = arith.constant 0 : index
      %30 = vector.load %arg8[%c0_19, %c0_20] : memref<16x32xf32, #tpu.memory_space<vmem>>, vector<16x32xf32>
      %c0_21 = arith.constant 0 : index
      %c0_22 = arith.constant 0 : index
      %31 = vector.load %arg7[%c0_21, %c0_22] : memref<16x32xf32, #tpu.memory_space<vmem>>, vector<16x32xf32>
      tpu.vector_store %arg7[%c0_21, %c0_22], %30 {strides = array<i32>} : memref<16x32xf32, #tpu.memory_space<vmem>>, vector<16x32xf32>,
    } else {
    }
    return
  }
  func.func @transform_0(%arg0: i32, %arg1: i32) -> (i32, i32) {
    %c0_i32 = arith.constant 0 : i32
    %c0_i32_0 = arith.constant 0 : i32
    return %arg0, %c0_i32 : i32, i32
  }
  func.func @transform_1(%arg0: i32, %arg1: i32) -> (i32, i32) {
    %c0_i32 = arith.constant 0 : i32
    %c0_i32_0 = arith.constant 0 : i32
    return %c0_i32, %arg1 : i32, i32
  }
  func.func @transform_2(%arg0: i32, %arg1: i32) -> (i32, i32) {
    %c0_i32 = arith.constant 0 : i32
    %c0_i32_0 = arith.constant 0 : i32
    return %c0_i32, %arg1 : i32, i32
  }
  func.func @transform_3(%arg0: i32, %arg1: i32) -> (i32, i32) {
    %c0_i32 = arith.constant 0 : i32
    %c0_i32_0 = arith.constant 0 : i32
    return %arg1, %c0_i32 : i32, i32
  }
  func.func @transform_4(%arg0: i32, %arg1: i32) -> (i32, i32) {
    %c0_i32 = arith.constant 0 : i32
    %c0_i32_0 = arith.constant 0 : i32
    %c0_i32_1 = arith.constant 0 : i32
    return %c0_i32, %c0_i32_0 : i32, i32
  }
  func.func @transform_5(%arg0: i32, %arg1: i32) -> (i32, i32) {
    %c0_i32 = arith.constant 0 : i32
    %c0_i32_0 = arith.constant 0 : i32
    return %arg0, %c0_i32 : i32, i32
  }
}

module attributes {stable_mosaic.version = 11 : i64} {
  func.func @_ffn_kernel(%arg0: i32, %arg1: i32, %arg2: memref<16x32xf32, #tpu.memory_space<vmem>>, %arg3: memref<32x64xf32, #tpu.memory_space<vmem>>, %arg4: memref<1x64xf32, #tpu.memory_space<vmem>>, %arg5: memref<64x32xf32, #tpu.memory_space<vmem>>, %arg6: memref<1x32xf32, #tpu.memory_space<vmem>>, %arg7: memref<16x32xf32, #tpu.memory_space<vmem>>, %arg8: memref<16x32xf32, #tpu.memory_space<vmem>>) attributes {dimension_semantics = [#tpu.dimension_semantics<parallel>, #tpu.dimension_semantics<arbitrary>], iteration_bounds = array<i64: 1, 1>, scalar_prefetch = 0 : i64, scratch_operands = 1 : i64, tpu.core_type = #tpu.core_type<tc>, window_params = [{transform_indices = @transform_0, window_bounds = array<i64: 16, 32>}, {transform_indices = @transform_1, window_bounds = array<i64: 32, 64>}, {transform_indices = @transform_2, window_bounds = array<i64: 1, 64>}, {transform_indices = @transform_3, window_bounds = array<i64: 64, 32>}, {pipeline_mode = #tpu.pipeline_mode<synchronous>, transform_indices = @transform_4, window_bounds = array<i64: 1, 32>}, {transform_indices = @transform_5, window_bounds = array<i64: 16, 32>}]} {
    %c0_i32 = arith.constant 0 : i32
    %0 = arith.cmpi eq, %arg1, %c0_i32 : i32
    %1 = arith.extui %0 : i1 to i32
    %c0_i32_0 = arith.constant 0 : i32
    %2 = arith.cmpi ne, %1, %c0_i32_0 : i32
    scf.if %2 {
      %c0_19 = arith.constant 0 : index
      %c0_20 = arith.constant 0 : index
      %30 = vector.load %arg6[%c0_19, %c0_20] : memref<1x32xf32, #tpu.memory_space<vmem>>, vector<1x32xf32>
      %31 = vector.shape_cast %30 : vector<1x32xf32> to vector<1x32xf32>
      %32 = vector.broadcast %31 : vector<1x32xf32> to vector<16x32xf32>
      %c0_21 = arith.constant 0 : index
      %c0_22 = arith.constant 0 : index
      %33 = vector.load %arg8[%c0_21, %c0_22] : memref<16x32xf32, #tpu.memory_space<vmem>>, vector<16x32xf32>
      tpu.vector_store %arg8[%c0_21, %c0_22], %32 {strides = array<i32>} : memref<16x32xf32, #tpu.memory_space<vmem>>, vector<16x32xf32>,
    } else {
    }
    %c0 = arith.constant 0 : index
    %c0_1 = arith.constant 0 : index
    %3 = vector.load %arg2[%c0, %c0_1] : memref<16x32xf32, #tpu.memory_space<vmem>>, vector<16x32xf32>
    %c0_2 = arith.constant 0 : index
    %c0_3 = arith.constant 0 : index
    %4 = vector.load %arg3[%c0_2, %c0_3] : memref<32x64xf32, #tpu.memory_space<vmem>>, vector<32x64xf32>
    %cst = arith.constant dense<0.000000e+00> : vector<16x64xf32>
    %5 = tpu.matmul %3, %4, %cst {dimension_numbers = #tpu.dot_dimension_numbers<[1], [0], [0], [1], [0, 0, 1, 1], [], []>} : vector<16x32xf32>, vector<32x64xf32>, vector<16x64xf32> -> vector<16x64xf32>
    %c0_4 = arith.constant 0 : index
    %c0_5 = arith.constant 0 : index
    %6 = vector.load %arg4[%c0_4, %c0_5] : memref<1x64xf32, #tpu.memory_space<vmem>>, vector<1x64xf32>
    %7 = vector.broadcast %6 : vector<1x64xf32> to vector<16x64xf32>
    %8 = arith.addf %5, %7 : vector<16x64xf32>
    %cst_6 = arith.constant 5.000000e-01 : f32
    %9 = vector.broadcast %cst_6 : f32 to vector<16x64xf32>
    %10 = arith.mulf %9, %8 : vector<16x64xf32>
    %11 = arith.mulf %8, %8 : vector<16x64xf32>
    %12 = arith.mulf %11, %8 : vector<16x64xf32>
    %cst_7 = arith.constant 4.471500e-02 : f32
    %13 = vector.broadcast %cst_7 : f32 to vector<16x64xf32>
    %14 = arith.mulf %13, %12 : vector<16x64xf32>
    %15 = arith.addf %8, %14 : vector<16x64xf32>
    %cst_8 = arith.constant 0.797884583 : f32
    %16 = vector.broadcast %cst_8 : f32 to vector<16x64xf32>
    %17 = arith.mulf %16, %15 : vector<16x64xf32>
    %18 = math.tanh %17 : vector<16x64xf32>
    %cst_9 = arith.constant 1.000000e+00 : f32
    %19 = vector.broadcast %cst_9 : f32 to vector<16x64xf32>
    %20 = arith.addf %19, %18 : vector<16x64xf32>
    %21 = arith.mulf %10, %20 : vector<16x64xf32>
    %c0_10 = arith.constant 0 : index
    %c0_11 = arith.constant 0 : index
    %22 = vector.load %arg8[%c0_10, %c0_11] : memref<16x32xf32, #tpu.memory_space<vmem>>, vector<16x32xf32>
    %c0_12 = arith.constant 0 : index
    %c0_13 = arith.constant 0 : index
    %23 = vector.load %arg5[%c0_12, %c0_13] : memref<64x32xf32, #tpu.memory_space<vmem>>, vector<64x32xf32>
    %cst_14 = arith.constant dense<0.000000e+00> : vector<16x32xf32>
    %24 = tpu.matmul %21, %23, %cst_14 {dimension_numbers = #tpu.dot_dimension_numbers<[1], [0], [0], [1], [0, 0, 1, 1], [], []>} : vector<16x64xf32>, vector<64x32xf32>, vector<16x32xf32> -> vector<16x32xf32>
    %25 = arith.addf %22, %24 : vector<16x32xf32>
    %c0_15 = arith.constant 0 : index
    %c0_16 = arith.constant 0 : index
    %26 = vector.load %arg8[%c0_15, %c0_16] : memref<16x32xf32, #tpu.memory_space<vmem>>, vector<16x32xf32>
    tpu.vector_store %arg8[%c0_15, %c0_16], %25 {strides = array<i32>} : memref<16x32xf32, #tpu.memory_space<vmem>>, vector<16x32xf32>,
    %c0_i32_17 = arith.constant 0 : i32
    %27 = arith.cmpi eq, %arg1, %c0_i32_17 : i32
    %28 = arith.extui %27 : i1 to i32
    %c0_i32_18 = arith.constant 0 : i32
    %29 = arith.cmpi ne, %28, %c0_i32_18 : i32
    scf.if %29 {
      %c0_19 = arith.constant 0 : index
      %c0_20 = arith.constant 0 : index
      %30 = vector.load %arg8[%c0_19, %c0_20] : memref<16x32xf32, #tpu.memory_space<vmem>>, vector<16x32xf32>
      %c0_21 = arith.constant 0 : index
      %c0_22 = arith.constant 0 : index
      %31 = vector.load %arg7[%c0_21, %c0_22] : memref<16x32xf32, #tpu.memory_space<vmem>>, vector<16x32xf32>
      tpu.vector_store %arg7[%c0_21, %c0_22], %30 {strides = array<i32>} : memref<16x32xf32, #tpu.memory_space<vmem>>, vector<16x32xf32>,
    } else {
    }
    return
  }
  func.func @transform_0(%arg0: i32, %arg1: i32) -> (i32, i32) {
    %c0_i32 = arith.constant 0 : i32
    %c0_i32_0 = arith.constant 0 : i32
    return %arg0, %c0_i32 : i32, i32
  }
  func.func @transform_1(%arg0: i32, %arg1: i32) -> (i32, i32) {
    %c0_i32 = arith.constant 0 : i32
    %c0_i32_0 = arith.constant 0 : i32
    return %c0_i32, %arg1 : i32, i32
  }
  func.func @transform_2(%arg0: i32, %arg1: i32) -> (i32, i32) {
    %c0_i32 = arith.constant 0 : i32
    %c0_i32_0 = arith.constant 0 : i32
    return %c0_i32, %arg1 : i32, i32
  }
  func.func @transform_3(%arg0: i32, %arg1: i32) -> (i32, i32) {
    %c0_i32 = arith.constant 0 : i32
    %c0_i32_0 = arith.constant 0 : i32
    return %arg1, %c0_i32 : i32, i32
  }
  func.func @transform_4(%arg0: i32, %arg1: i32) -> (i32, i32) {
    %c0_i32 = arith.constant 0 : i32
    %c0_i32_0 = arith.constant 0 : i32
    %c0_i32_1 = arith.constant 0 : i32
    return %c0_i32, %c0_i32_0 : i32, i32
  }
  func.func @transform_5(%arg0: i32, %arg1: i32) -> (i32, i32) {
    %c0_i32 = arith.constant 0 : i32
    %c0_i32_0 = arith.constant 0 : i32
    return %arg0, %c0_i32 : i32, i32
  }
}

</mosaic_0001>

<bundles_post_ra>
// kernel: _feed_forward_impl.1
= control target key start
LH: loop header
LB: loop body
LE: loop exit
PB: predicated region body
PF: predicated region fallthrough
CT: control target
= control target key end

     0   :  { %vm32_vm0 = vcmask 261120   ;;  %s475_s0 = inlined_call_operand.vmem [shape: f32[16,32], index: 0, kind: input, shape index: {}]   ;;  %s476_s1 = inlined_call_operand.vmem [shape: f32[32,64], index: 1, kind: input, shape index: {}]   ;;  %s477_s2 = inlined_call_operand.vmem [shape: f32[1,64], index: 2, kind: input, shape index: {}]   ;;  %s478_s3 = inlined_call_operand.vmem [shape: f32[64,32], index: 3, kind: input, shape index: {}]   ;;  %s479_s4 = inlined_call_operand.vmem [shape: f32[1,32], index: 4, kind: input, shape index: {}]   ;;  %s480_s5 = inlined_call_operand.hbm [shape: f32[16,32], index: 5, kind: output, shape index: {}]  }
   0x1   :  { %v37_v0 = vld [vmem:[%s476_s1] sm:$0xff]  ;;  %v38_v1 = vld [vmem:[%s476_s1 + $0x8] sm:$0xff]  ;;  %v39_v2 = vld [vmem:[%s476_s1 + $0x10] sm:$0xff] }
   0x2   :  { %v319_v3 = vpack.c.bf16 %v38_v1, %v37_v0  ;;  %v40_v4 = vld [vmem:[%s476_s1 + $0x18] sm:$0xff]  ;;  %v35_v5 = vld [vmem:[%s475_s0] sm:$0xff] }
   0x3   :  { %v323_v6 = vpack.c.bf16 %v40_v4, %v39_v2  ;;  %297 = vmatprep.mubr.msk.f32.mxu0 %vm32_vm0, %v35_v5 }
   0x4   :  { %10 = vsyncpa [#allocation4], 0  ;;  %320 = vmatprep.subr.bf16.mxu0 %v319_v3  ;;  %v36_v7 = vld [vmem:[%s475_s0 + $0x8] sm:$0xff]  ;;  %v150_v8 = vld [vmem:[%s478_s3] sm:$0xff]  ;;  %vm158_vm1 = vcmask 523264  }
   0x5   :  { %322 = vmatpush3.bf16.msra.mxu0 %v319_v3  ;;  %v151_v9 = vld [vmem:[%s478_s3 + $0x8] sm:$0xff]  ;;  %v152_v11 = vld [vmem:[%s478_s3 + $0x10] sm:$0xff]  ;;  %v153_v12 = vld [vmem:[%s478_s3 + $0x18] sm:$0xff] }
   0x6   :  { %324 = vmatprep.subr.bf16.mxu0 %v323_v6  ;;  %v327_v10 = vpack.c.bf16 %v151_v9, %v150_v8  ;;  %v154_v13 = vld [vmem:[%s478_s3 + $0x20] sm:$0xff]  ;;  %v331_v14 = vpack.c.bf16 %v153_v12, %v152_v11  ;;  %v155_v15 = vld [vmem:[%s478_s3 + $0x28] sm:$0xff]  ;;  %v156_v17 = vld [vmem:[%s478_s3 + $0x30] sm:$0xff] }
   0x7   :  { %v335_v16 = vpack.c.bf16 %v155_v15, %v154_v13  ;;  %v157_v18 = vld [vmem:[%s478_s3 + $0x38] sm:$0xff]  ;;  %v267_v20 = vld [vmem:[%s479_s4] ss:$0 sm:$0xff] }
   0x8   :  { %328 = vmatprep.subr.bf16.mxu1 %v327_v10  ;;  %v339_v19 = vpack.c.bf16 %v157_v18, %v156_v17  ;;  %34 = vst.msk [vmem:[#allocation2 + $0x8] sm:$0xff] %vm32_vm0, %v267_v20  ;;  %33 = vst.msk [vmem:[#allocation2] sm:$0xff] %vm32_vm0, %v267_v20  ;;  %v268_v21 = vld [vmem:[%s477_s2] ss:$0 sm:$0xff]  ;;  %s374_s2 = smov [#allocation3]  }
   0x9   :  { %326 = vmatpush3.bf16.msra.mxu0 %v323_v6  ;;  %330 = vmatpush3.bf16.msra.mxu1 %v327_v10  ;;  %s256_s3 = sshll.u32 %s374_s2, 4  ;;  %s257_s3 = int_to_ptr.vmem [resolvable:$true] %s256_s3 }
   0xa   :  { %332 = vmatprep.subr.bf16.mxu1 %v331_v14  ;;  %s350_s4 = scalar_lea.vmem %s257_s3, 256  ;;  %p355_p1 = scmp.lt.s32.totalorder %s257_s3, %s257_s3 }
   0xb   :  { %p351_p0 = scmp.ne.s32.totalorder %s257_s3, %s350_s4  ;;  %p356_p2 = scmp.lt.s32.totalorder %s350_s4, %s350_s4 }
   0xc   :  { %298 = vmatmul.mubr.msk.f32.vlgmr.msra.gmra.mrb[0].mxu0 %vm32_vm0, %v36_v7 }
   0xd   :  { %334 = vmatpush3.bf16.msra.mxu1 %v331_v14  ;;  %p357_p3 = por %p356_p2, %p355_p1 }
   0xe   :  { %336 = vmatprep.subr.bf16.mxu1 %v335_v16 }
   0xf   :  { %v149_v44 = vld [vmem:[#allocation2 + $0x8] sm:$0xff]  ;;  %v148_v45 = vld [vmem:[#allocation2] sm:$0xff]  ;;  %p358_p4 = pnand %p357_p3, %p351_p0 }
  0x11   :  { %338 = vmatpush3.bf16.msra.mxu1 %v335_v16 }
  0x12   :  { %340 = vmatprep.subr.bf16.mxu1 %v339_v19 }
  0x15   :  { %342 = vmatpush3.bf16.msra.mxu1 %v339_v19 }
  0xdf   :  { %v299_v22 = vpop.f32.mrb[0].mxu0 }
  0xe0   :  { %v127_v23 = vadd.f32 %v299_v22, %v268_v21  ;;  %v121_v24 = vpop.f32.mrb[1].mxu0 }
  0xe1   :  { %v122_v25 = vadd.f32 %v268_v21, %v121_v24 }
  0xe2   :  { %v133_v26 = vmul.f32 %v127_v23, %v127_v23  ;;  %v131_v41 = vmul.f32 0.5, %v127_v23 }
  0xe3   :  { %v132_v27 = vmul.f32 %v122_v25, %v122_v25  ;;  %v130_v39 = vmul.f32 0.5, %v122_v25 }
  0xe4   :  { %v135_v28 = vmul.f32 %v133_v26, %v127_v23 }
  0xe5   :  { %v134_v29 = vmul.f32 %v132_v27, %v122_v25 }
  0xe6   :  { %v137_v30 = vmul.f32 0.044715, %v135_v28 }
  0xe7   :  { %v136_v31 = vmul.f32 0.044715, %v134_v29 }
  0xe8   :  { %v139_v32 = vadd.f32 %v137_v30, %v127_v23 }
  0xe9   :  { %v138_v33 = vadd.f32 %v136_v31, %v122_v25 }
  0xea   :  { %v141_v34 = vmul.f32 0.7978846, %v139_v32 }
  0xeb   :  { %v140_v35 = vmul.f32 0.7978846, %v138_v33 }
  0xec   :  { %346 = vtanh.f32 %v141_v34 }
  0xed   :  { %348 = vtanh.f32 %v140_v35 }
  0xf6   :  { %v347_v36 = vpop.eup %346 }
  0xf7   :  { %v349_v37 = vpop.eup %348  ;;  %v145_v38 = vadd.f32 1.0, %v347_v36 }
  0xf8   :  { %v144_v40 = vadd.f32 1.0, %v349_v37 }
  0xf9   :  { %v147_v43 = vmul.f32 %v145_v38, %v131_v41 }
  0xfa   :  { %v146_v42 = vmul.f32 %v144_v40, %v130_v39 }
  0xfc   :  { %316 = vmatprep.mubr.msk.f32.mxu1 %vm158_vm1, %v146_v42 }
  0xfd   :  { %317 = vmatmul.mubr.msk.f32.vlgmr.msra.gmra.mrb[0].mxu1 %vm158_vm1, %v147_v43 }
 0x1d0   :  { %v318_v46 = vpop.f32.mrb[0].mxu1 }
 0x1d1   :  { %v241_v47 = vadd.f32 %v318_v46, %v149_v44  ;;  %v231_v48 = vpop.f32.mrb[1].mxu1 }
 0x1d2   :  { %v240_v49 = vadd.f32 %v231_v48, %v148_v45 }
 0x1d3   :  { %243 = vst.msk [vmem:[#allocation2 + $0x8] sm:$0xff] %vm32_vm0, %v241_v47 }
 0x1d4   :  { %242 = vst.msk [vmem:[#allocation2] sm:$0xff] %vm32_vm0, %v240_v49 }
 0x1da   :  { %v248_v50 = vld [vmem:[#allocation2 + $0x8] sm:$0xff] }
 0x1db   :  { %v247_v51 = vld [vmem:[#allocation2] sm:$0xff]  ;;  %250 = vst.msk [vmem:[#allocation3 + $0x8] sm:$0xff] %vm32_vm0, %v248_v50 }
 0x1dc   :  { %249 = vst.msk [vmem:[#allocation3] sm:$0xff] %vm32_vm0, %v247_v51 }
 0x1dd   :  { %361 = shalt.err (!%p358_p4)
}
 0x1de   :  { %s362_s25 = scalar_lea.hbm %s480_s5, 256 }
 0x1df   :  { %p363_p5 = scmp.ne.s32.totalorder %s480_s5, %s362_s25  ;;  %p366_p6 = scmp.lt.u32.totalorder %s362_s25, %s480_s5 }
 0x1e1   :  { %p368_p7 = pnand %p366_p6, %p363_p5 }
 0x1e3   :  { %371 = shalt.err (!%p368_p7)
}
 0x1e4   :  { %s375_s30 = smov 128   ;;  %s376_s1 = smov 8  }
 0x1e5   :  { %262 = dma.vmem_to_hbm [thread:$0]  %s257_s3, 256, %s480_s5, [#allocation4], %s375_s30, %s375_s30, %s376_s1  }
 0x1e6   :  { %372 = dma.done.wait [#allocation4], 256  }
 0x1e7   :  { %373 = vsyncadd [#allocation4], 4294967040 }
 0x1e8   :  { %266 = vsyncpa [#allocation4], 1 }

// kernel: _feed_forward_impl.1
= control target key start
LH: loop header
LB: loop body
LE: loop exit
PB: predicated region body
PF: predicated region fallthrough
CT: control target
= control target key end

     0   :  { %vm32_vm0 = vcmask 261120   ;;  %s475_s0 = inlined_call_operand.vmem [shape: f32[16,32], index: 0, kind: input, shape index: {}]   ;;  %s476_s1 = inlined_call_operand.vmem [shape: f32[32,64], index: 1, kind: input, shape index: {}]   ;;  %s477_s2 = inlined_call_operand.vmem [shape: f32[1,64], index: 2, kind: input, shape index: {}]   ;;  %s478_s3 = inlined_call_operand.vmem [shape: f32[64,32], index: 3, kind: input, shape index: {}]   ;;  %s479_s4 = inlined_call_operand.vmem [shape: f32[1,32], index: 4, kind: input, shape index: {}]   ;;  %s480_s5 = inlined_call_operand.hbm [shape: f32[16,32], index: 5, kind: output, shape index: {}]  }
   0x1   :  { %v37_v0 = vld [vmem:[%s476_s1] sm:$0xff]  ;;  %v38_v1 = vld [vmem:[%s476_s1 + $0x8] sm:$0xff]  ;;  %v39_v2 = vld [vmem:[%s476_s1 + $0x10] sm:$0xff] }
   0x2   :  { %v319_v3 = vpack.c.bf16 %v38_v1, %v37_v0  ;;  %v40_v4 = vld [vmem:[%s476_s1 + $0x18] sm:$0xff]  ;;  %v35_v5 = vld [vmem:[%s475_s0] sm:$0xff] }
   0x3   :  { %v323_v6 = vpack.c.bf16 %v40_v4, %v39_v2  ;;  %297 = vmatprep.mubr.msk.f32.mxu0 %vm32_vm0, %v35_v5 }
   0x4   :  { %10 = vsyncpa [#allocation4], 0  ;;  %320 = vmatprep.subr.bf16.mxu0 %v319_v3  ;;  %v36_v7 = vld [vmem:[%s475_s0 + $0x8] sm:$0xff]  ;;  %v150_v8 = vld [vmem:[%s478_s3] sm:$0xff]  ;;  %vm158_vm1 = vcmask 523264  }
   0x5   :  { %322 = vmatpush3.bf16.msra.mxu0 %v319_v3  ;;  %v151_v9 = vld [vmem:[%s478_s3 + $0x8] sm:$0xff]  ;;  %v152_v11 = vld [vmem:[%s478_s3 + $0x10] sm:$0xff]  ;;  %v153_v12 = vld [vmem:[%s478_s3 + $0x18] sm:$0xff] }
   0x6   :  { %324 = vmatprep.subr.bf16.mxu0 %v323_v6  ;;  %v327_v10 = vpack.c.bf16 %v151_v9, %v150_v8  ;;  %v154_v13 = vld [vmem:[%s478_s3 + $0x20] sm:$0xff]  ;;  %v331_v14 = vpack.c.bf16 %v153_v12, %v152_v11  ;;  %v155_v15 = vld [vmem:[%s478_s3 + $0x28] sm:$0xff]  ;;  %v156_v17 = vld [vmem:[%s478_s3 + $0x30] sm:$0xff] }
   0x7   :  { %v335_v16 = vpack.c.bf16 %v155_v15, %v154_v13  ;;  %v157_v18 = vld [vmem:[%s478_s3 + $0x38] sm:$0xff]  ;;  %v267_v20 = vld [vmem:[%s479_s4] ss:$0 sm:$0xff] }
   0x8   :  { %328 = vmatprep.subr.bf16.mxu1 %v327_v10  ;;  %v339_v19 = vpack.c.bf16 %v157_v18, %v156_v17  ;;  %34 = vst.msk [vmem:[#allocation2 + $0x8] sm:$0xff] %vm32_vm0, %v267_v20  ;;  %33 = vst.msk [vmem:[#allocation2] sm:$0xff] %vm32_vm0, %v267_v20  ;;  %v268_v21 = vld [vmem:[%s477_s2] ss:$0 sm:$0xff]  ;;  %s374_s2 = smov [#allocation3]  }
   0x9   :  { %326 = vmatpush3.bf16.msra.mxu0 %v323_v6  ;;  %330 = vmatpush3.bf16.msra.mxu1 %v327_v10  ;;  %s256_s3 = sshll.u32 %s374_s2, 4  ;;  %s257_s3 = int_to_ptr.vmem [resolvable:$true] %s256_s3 }
   0xa   :  { %332 = vmatprep.subr.bf16.mxu1 %v331_v14  ;;  %s350_s4 = scalar_lea.vmem %s257_s3, 256  ;;  %p355_p1 = scmp.lt.s32.totalorder %s257_s3, %s257_s3 }
   0xb   :  { %p351_p0 = scmp.ne.s32.totalorder %s257_s3, %s350_s4  ;;  %p356_p2 = scmp.lt.s32.totalorder %s350_s4, %s350_s4 }
   0xc   :  { %298 = vmatmul.mubr.msk.f32.vlgmr.msra.gmra.mrb[0].mxu0 %vm32_vm0, %v36_v7 }
   0xd   :  { %334 = vmatpush3.bf16.msra.mxu1 %v331_v14  ;;  %p357_p3 = por %p356_p2, %p355_p1 }
   0xe   :  { %336 = vmatprep.subr.bf16.mxu1 %v335_v16 }
   0xf   :  { %v149_v44 = vld [vmem:[#allocation2 + $0x8] sm:$0xff]  ;;  %v148_v45 = vld [vmem:[#allocation2] sm:$0xff]  ;;  %p358_p4 = pnand %p357_p3, %p351_p0 }
  0x11   :  { %338 = vmatpush3.bf16.msra.mxu1 %v335_v16 }
  0x12   :  { %340 = vmatprep.subr.bf16.mxu1 %v339_v19 }
  0x15   :  { %342 = vmatpush3.bf16.msra.mxu1 %v339_v19 }
  0xdf   :  { %v299_v22 = vpop.f32.mrb[0].mxu0 }
  0xe0   :  { %v127_v23 = vadd.f32 %v299_v22, %v268_v21  ;;  %v121_v24 = vpop.f32.mrb[1].mxu0 }
  0xe1   :  { %v122_v25 = vadd.f32 %v268_v21, %v121_v24 }
  0xe2   :  { %v133_v26 = vmul.f32 %v127_v23, %v127_v23  ;;  %v131_v41 = vmul.f32 0.5, %v127_v23 }
  0xe3   :  { %v132_v27 = vmul.f32 %v122_v25, %v122_v25  ;;  %v130_v39 = vmul.f32 0.5, %v122_v25 }
  0xe4   :  { %v135_v28 = vmul.f32 %v133_v26, %v127_v23 }
  0xe5   :  { %v134_v29 = vmul.f32 %v132_v27, %v122_v25 }
  0xe6   :  { %v137_v30 = vmul.f32 0.044715, %v135_v28 }
  0xe7   :  { %v136_v31 = vmul.f32 0.044715, %v134_v29 }
  0xe8   :  { %v139_v32 = vadd.f32 %v137_v30, %v127_v23 }
  0xe9   :  { %v138_v33 = vadd.f32 %v136_v31, %v122_v25 }
  0xea   :  { %v141_v34 = vmul.f32 0.7978846, %v139_v32 }
  0xeb   :  { %v140_v35 = vmul.f32 0.7978846, %v138_v33 }
  0xec   :  { %346 = vtanh.f32 %v141_v34 }
  0xed   :  { %348 = vtanh.f32 %v140_v35 }
  0xf6   :  { %v347_v36 = vpop.eup %346 }
  0xf7   :  { %v349_v37 = vpop.eup %348  ;;  %v145_v38 = vadd.f32 1.0, %v347_v36 }
  0xf8   :  { %v144_v40 = vadd.f32 1.0, %v349_v37 }
  0xf9   :  { %v147_v43 = vmul.f32 %v145_v38, %v131_v41 }
  0xfa   :  { %v146_v42 = vmul.f32 %v144_v40, %v130_v39 }
  0xfc   :  { %316 = vmatprep.mubr.msk.f32.mxu1 %vm158_vm1, %v146_v42 }
  0xfd   :  { %317 = vmatmul.mubr.msk.f32.vlgmr.msra.gmra.mrb[0].mxu1 %vm158_vm1, %v147_v43 }
 0x1d0   :  { %v318_v46 = vpop.f32.mrb[0].mxu1 }
 0x1d1   :  { %v241_v47 = vadd.f32 %v318_v46, %v149_v44  ;;  %v231_v48 = vpop.f32.mrb[1].mxu1 }
 0x1d2   :  { %v240_v49 = vadd.f32 %v231_v48, %v148_v45 }
 0x1d3   :  { %243 = vst.msk [vmem:[#allocation2 + $0x8] sm:$0xff] %vm32_vm0, %v241_v47 }
 0x1d4   :  { %242 = vst.msk [vmem:[#allocation2] sm:$0xff] %vm32_vm0, %v240_v49 }
 0x1da   :  { %v248_v50 = vld [vmem:[#allocation2 + $0x8] sm:$0xff] }
 0x1db   :  { %v247_v51 = vld [vmem:[#allocation2] sm:$0xff]  ;;  %250 = vst.msk [vmem:[#allocation3 + $0x8] sm:$0xff] %vm32_vm0, %v248_v50 }
 0x1dc   :  { %249 = vst.msk [vmem:[#allocation3] sm:$0xff] %vm32_vm0, %v247_v51 }
 0x1dd   :  { %361 = shalt.err (!%p358_p4)
}
 0x1de   :  { %s362_s25 = scalar_lea.hbm %s480_s5, 256 }
 0x1df   :  { %p363_p5 = scmp.ne.s32.totalorder %s480_s5, %s362_s25  ;;  %p366_p6 = scmp.lt.u32.totalorder %s362_s25, %s480_s5 }
 0x1e1   :  { %p368_p7 = pnand %p366_p6, %p363_p5 }
 0x1e3   :  { %371 = shalt.err (!%p368_p7)
}
 0x1e4   :  { %s375_s30 = smov 128   ;;  %s376_s1 = smov 8  }
 0x1e5   :  { %262 = dma.vmem_to_hbm [thread:$0]  %s257_s3, 256, %s480_s5, [#allocation4], %s375_s30, %s375_s30, %s376_s1  }
 0x1e6   :  { %372 = dma.done.wait [#allocation4], 256  }
 0x1e7   :  { %373 = vsyncadd [#allocation4], 4294967040 }
 0x1e8   :  { %266 = vsyncpa [#allocation4], 1 }

</bundles_post_ra>
